<compile_context>
chip_gen: v7x
topology: tpu7x:2x2x1
jax: 0.10.0
libtpu: 0.0.40
codegen_flags: <defaults>
</compile_context>

<pallas_src>
import jax
import jax.numpy as jnp
from jax.experimental import pallas as pl
from jax.experimental.pallas import tpu as pltpu


def _round_up(x, m):
    return (x + m - 1) // m * m


def _cdiv(a, b):
    return (a + b - 1) // b


# --------------------------------------------------------------------------
# Kernels
# --------------------------------------------------------------------------
def _decoder_fused_kernel(z_ref, wfc_ref, w2_ref, wh_ref, b_ref, out_ref):
    """Fused head path.
       wfc: (m, P) fc weight (zero-padded cols beyond n)
       w2 : (P, P) dec2 weight
       wh : (P, P) fused head weight  [dec1_mean | dec1_logs2 | 0]
       b  : (4, P) f32 biases, rows = [b_fc, b_dec2, b_head, unused]
       out: (TB, P) lane-dense output (mean in [:, :n], logs2 in [:, n])."""
    cdt = wfc_ref.dtype                       # MXU operand dtype (f32 or bf16)
    z = z_ref[...].astype(cdt)                # in-kernel cast (free under MXU/DMA)

    inter = (jnp.dot(z, wfc_ref[...], preferred_element_type=jnp.float32)
             + b_ref[0:1, :])
    h = jnp.maximum(
        jnp.dot(inter.astype(cdt), w2_ref[...], preferred_element_type=jnp.float32)
        + b_ref[1:2, :], 0.0)
    out = (jnp.dot(h.astype(cdt), wh_ref[...], preferred_element_type=jnp.float32)
           + b_ref[2:3, :])
    out_ref[...] = out.astype(out_ref.dtype)


def _decoder_split_kernel(z_ref, wfc_ref, w2_ref, wh_ref, wls_ref, b_ref,
                          mean_ref, logs2_ref):
    """Split-logs2 path (n % 128 == 0): mean via MXU, logs2 via row-reduction.
       wh : (P, P) dec1_mean weight (P == n)
       wls: (1, P) dec1_logs2 weight row
       b  : (4, P) f32 biases, rows = [b_fc, b_dec2, b_mean, b_logs2@col0]."""
    cdt = wfc_ref.dtype
    z = z_ref[...].astype(cdt)

    inter = (jnp.dot(z, wfc_ref[...], preferred_element_type=jnp.float32)
             + b_ref[0:1, :])
    h = jnp.maximum(
        jnp.dot(inter.astype(cdt), w2_ref[...], preferred_element_type=jnp.float32)
        + b_ref[1:2, :], 0.0)
    mean = (jnp.dot(h.astype(cdt), wh_ref[...], preferred_element_type=jnp.float32)
            + b_ref[2:3, :])
    mean_ref[...] = mean.astype(mean_ref.dtype)

    # logs2 = h @ w_logs2 + b_logs2 as a VPU multiply + XLU reduce; avoids a
    # whole extra 128-lane MXU column block just for one output column.
    b_ls = jnp.sum(b_ref[3:4, :], axis=-1, keepdims=True)        # only col 0 nonzero
    logs2 = (jnp.sum(h * wls_ref[...].astype(jnp.float32), axis=-1, keepdims=True)
             + b_ls)
    logs2_ref[...] = logs2.astype(logs2_ref.dtype)


# --------------------------------------------------------------------------
# Parameter packing: fuse/pad weights to lane-dense P, pack f32 biases.
# --------------------------------------------------------------------------
def pack_decoder_params(params, fit_s2, compute_dtype=jnp.bfloat16):
    w_fc, b_fc = params["w_fc"], params["b_fc"]          # (m, n), (1, n)
    w_d2, b_d2 = params["w_dec2"], params["b_dec2"]      # (n, n), (1, n)
    w_mn, b_mn = params["w_mean"], params["b_mean"]      # (n, n), (1, n)
    m, n = w_fc.shape

    split_logs2 = bool(fit_s2) and (n % 128 == 0)        # +1 col would waste a 128-lane block
    fuse_logs2 = bool(fit_s2) and not split_logs2

    if fuse_logs2:
        w_head = jnp.concatenate([w_mn, params["w_logs2"]], axis=1)   # (n, n+1)
        b_head = jnp.concatenate([b_mn, params["b_logs2"]], axis=1)   # (1, n+1)
    else:
        w_head, b_head = w_mn, b_mn

    P = _round_up(max(n, w_head.shape[1]), 128)          # lane-dense width

    def pad_w(w, rows, cols):
        return jnp.zeros((rows, cols), jnp.float32).at[:w.shape[0], :w.shape[1]].set(w)

    def pad_row(b):
        return jnp.zeros((1, P), jnp.float32).at[:, :b.shape[1]].set(b)

    b_ls_row = jnp.zeros((1, P), jnp.float32)
    if split_logs2:
        b_ls_row = b_ls_row.at[:, :1].set(params["b_logs2"])

    packed = {
        "w_fc":   pad_w(w_fc, m, P).astype(compute_dtype),
        "w_dec2": pad_w(w_d2, P, P).astype(compute_dtype),
        "w_head": pad_w(w_head, P, P).astype(compute_dtype),
        "b_all":  jnp.concatenate(
            [pad_row(b_fc), pad_row(b_d2), pad_row(b_head), b_ls_row], axis=0),
        "m": m, "n": n, "P": P,
        "fit_s2": bool(fit_s2),
        "split_logs2": split_logs2,
        "compute_dtype": compute_dtype,
    }
    if split_logs2:
        packed["w_logs2_row"] = pad_w(params["w_logs2"].T, 1, P).astype(compute_dtype)
    return packed


# --------------------------------------------------------------------------
# Wrapper
# --------------------------------------------------------------------------
def decoder_forward(z, packed, tb=1024, out_dtype=jnp.float32):
    """z: (B, m). Returns mean (B, n) [and logs2 (B, 1) if fit_s2]."""
    m, n, P = packed["m"], packed["n"], packed["P"]
    fit_s2 = packed["fit_s2"]
    split = packed["split_logs2"]
    cdt = packed["compute_dtype"]
    B = z.shape[0]

    # Batch tile: large (amortizes ~0.35us per grid step), multiple of 8, but
    # capped so the grid has >= 2 steps when B allows (keeps both v7x TCs busy).
    TB = max(8, min(int(tb), _round_up(_cdiv(B, 2), 8)))
    grid = (_cdiv(B, TB),)

    # Explicit scoped-VMEM budget: resident weights/biases + double-buffered
    # per-step blocks, with headroom; capped below v7x's 64 MiB physical VMEM.
    w_isz = jnp.dtype(cdt).itemsize
    o_isz = jnp.dtype(out_dtype).itemsize
    resident = (m * P + 2 * P * P + (P if split else 0)) * w_isz + 4 * P * 4
    per_step = TB * m * z.dtype.itemsize + TB * P * o_isz + (TB * o_isz if split else 0)
    vmem_limit = int(min(max(2 * (resident + per_step) + (2 << 20), 32 << 20), 56 << 20))

    cparams = pltpu.CompilerParams(
        dimension_semantics=("parallel",),      # megacore / v7x 2-TC sharding
        vmem_limit_bytes=vmem_limit)

    z_spec = pl.BlockSpec((TB, m), lambda i: (i, 0))        # batch-tiled, pipelined
    w_specs = [
        pl.BlockSpec((m, P), lambda i: (0, 0)),             # weights: resident (DMA once)
        pl.BlockSpec((P, P), lambda i: (0, 0)),
        pl.BlockSpec((P, P), lambda i: (0, 0)),
    ]
    b_spec = pl.BlockSpec((4, P), lambda i: (0, 0))
    out_spec = pl.BlockSpec((TB, P), lambda i: (i, 0))

    if split:
        mean, logs2 = pl.pallas_call(
            _decoder_split_kernel,
            out_shape=(jax.ShapeDtypeStruct((B, P), out_dtype),
                       jax.ShapeDtypeStruct((B, 1), out_dtype)),
            grid=grid,
            in_specs=[z_spec] + w_specs
                     + [pl.BlockSpec((1, P), lambda i: (0, 0)), b_spec],
            out_specs=(out_spec, pl.BlockSpec((TB, 1), lambda i: (i, 0))),
            compiler_params=cparams,
        )(z, packed["w_fc"], packed["w_dec2"], packed["w_head"],
          packed["w_logs2_row"], packed["b_all"])
        return mean, logs2                       # P == n here, no slicing needed

    out = pl.pallas_call(
        _decoder_fused_kernel,
        out_shape=jax.ShapeDtypeStruct((B, P), out_dtype),
        grid=grid,
        in_specs=[z_spec] + w_specs + [b_spec],
        out_specs=out_spec,
        compiler_params=cparams,
    )(z, packed["w_fc"], packed["w_dec2"], packed["w_head"], packed["b_all"])

    mean = out[:, :n]
    if fit_s2:
        return mean, out[:, n:n + 1]
    return mean


# --------------------------------------------------------------------------
# Deterministic parameter init (mirrors nn.Linear's U(-1/sqrt(fan_in), ...)),
# weights stored as (in, out), biases as (1, out).
# --------------------------------------------------------------------------
def init_decoder_params(key, m, n, fit_s2):
    def linear(key, fan_in, fan_out):
        kw, kb = jax.random.split(key)
        bound = 1.0 / jnp.sqrt(fan_in)
        w = jax.random.uniform(kw, (fan_in, fan_out), jnp.float32, -bound, bound)
        b = jax.random.uniform(kb, (1, fan_out), jnp.float32, -bound, bound)
        return w, b

    keys = jax.random.split(key, 4)
    w_fc, b_fc = linear(keys[0], m, n)       # fc: m -> n
    w_d2, b_d2 = linear(keys[1], n, n)       # dec2: n -> n
    w_mn, b_mn = linear(keys[2], n, n)       # dec1_mean: n -> n
    params = {"w_fc": w_fc, "b_fc": b_fc,
              "w_dec2": w_d2, "b_dec2": b_d2,
              "w_mean": w_mn, "b_mean": b_mn}
    if fit_s2:
        w_ls, b_ls = linear(keys[3], n, 1)   # dec1_logs2: n -> 1
        params["w_logs2"] = w_ls
        params["b_logs2"] = b_ls
    return params


# --------------------------------------------------------------------------
# Pure-JAX references for correctness checks
# --------------------------------------------------------------------------
def decoder_ref(z, params, fit_s2):
    inter = z @ params["w_fc"] + params["b_fc"]
    h = jnp.maximum(inter @ params["w_dec2"] + params["b_dec2"], 0.0)
    mean = h @ params["w_mean"] + params["b_mean"]
    if fit_s2:
        return mean, h @ params["w_logs2"] + params["b_logs2"]
    return mean


def decoder_ref_cast(z, params, fit_s2, cdt):
    """Reference with the same low-precision operand / f32-accumulate recipe."""
    def mm(x, w):
        return jnp.dot(x.astype(cdt), w.astype(cdt),
                       preferred_element_type=jnp.float32)
    inter = mm(z, params["w_fc"]) + params["b_fc"]
    h = jnp.maximum(mm(inter, params["w_dec2"]) + params["b_dec2"], 0.0)
    mean = mm(h, params["w_mean"]) + params["b_mean"]
    if fit_s2:
        return mean, mm(h, params["w_logs2"]) + params["b_logs2"]
    return mean


if __name__ == "__main__":
    key = jax.random.PRNGKey(0)
    kp, kz, kz2, kp2, kz3 = jax.random.split(key, 5)

    m, n = 16, 32
    params = init_decoder_params(kp, m, n, fit_s2=True)

    # --- f32 operands / f32 output, fit_s2=True, single tile -----------------
    B = 8
    z = jax.random.normal(kz, (B, m), dtype=jnp.float32)
    packed_f32 = pack_decoder_params(params, fit_s2=True, compute_dtype=jnp.float32)
    mean, logs2 = jax.block_until_ready(decoder_forward(z, packed_f32))
    mean_r, logs2_r = decoder_ref(z, params, True)
    assert mean.shape == (B, n) and logs2.shape == (B, 1)
    assert jnp.allclose(mean, mean_r, atol=1e-5, rtol=1e-5)
    assert jnp.allclose(logs2, logs2_r, atol=1e-5, rtol=1e-5)

    # --- fit_s2 = False path --------------------------------------------------
    packed_ns = pack_decoder_params(params, fit_s2=False, compute_dtype=jnp.float32)
    mean_only = jax.block_until_ready(decoder_forward(z, packed_ns))
    assert mean_only.shape == (B, n)
    assert jnp.allclose(mean_only, decoder_ref(z, params, False), atol=1e-5, rtol=1e-5)

    # --- multi-tile batch grid with a partial last block (no host-side pad) --
    B2 = 200
    z2 = jax.random.normal(kz2, (B2, m), dtype=jnp.float32)
    mean2, logs2_2 = jax.block_until_ready(decoder_forward(z2, packed_f32, tb=64))
    mean2_r, logs2_2_r = decoder_ref(z2, params, True)
    assert mean2.shape == (B2, n) and logs2_2.shape == (B2, 1)
    assert jnp.allclose(mean2, mean2_r, atol=1e-5, rtol=1e-5)
    assert jnp.allclose(logs2_2, logs2_2_r, atol=1e-5, rtol=1e-5)

    # --- default bf16 weights + bf16 output (MXU fast path, halved HBM out) --
    packed_bf16 = pack_decoder_params(params, fit_s2=True)   # bf16 by default
    mean_b, logs2_b = jax.block_until_ready(
        decoder_forward(z, packed_bf16, out_dtype=jnp.bfloat16))
    mean_br, logs2_br = decoder_ref_cast(z, params, True, jnp.bfloat16)
    assert mean_b.dtype == jnp.bfloat16 and logs2_b.dtype == jnp.bfloat16
    assert jnp.allclose(mean_b.astype(jnp.float32), mean_br, atol=5e-2, rtol=5e-2)
    assert jnp.allclose(logs2_b.astype(jnp.float32), logs2_br, atol=5e-2, rtol=5e-2)

    # --- lane-aligned n (n % 128 == 0): split-logs2 path, partial last block --
    n2 = 128
    params2 = init_decoder_params(kp2, m, n2, fit_s2=True)
    packed2 = pack_decoder_params(params2, fit_s2=True, compute_dtype=jnp.float32)
    B3 = 24
    z3 = jax.random.normal(kz3, (B3, m), dtype=jnp.float32)
    mean3, logs3 = jax.block_until_ready(decoder_forward(z3, packed2))
    mean3_r, logs3_r = decoder_ref(z3, params2, True)
    assert mean3.shape == (B3, n2) and logs3.shape == (B3, 1)
    assert jnp.allclose(mean3, mean3_r, atol=1e-4, rtol=1e-4)
    assert jnp.allclose(logs3, logs3_r, atol=1e-4, rtol=1e-4)

    print("KERNEL_OK")
</pallas_src>

<mosaic_0001>
module attributes {stable_mosaic.version = 11 : i64} {
  func.func @_decoder_fused_kernel(%arg0: i32, %arg1: memref<8x16xf32, #tpu.memory_space<vmem>>, %arg2: memref<16x128xf32, #tpu.memory_space<vmem>>, %arg3: memref<128x128xf32, #tpu.memory_space<vmem>>, %arg4: memref<128x128xf32, #tpu.memory_space<vmem>>, %arg5: memref<4x128xf32, #tpu.memory_space<vmem>>, %arg6: memref<8x128xf32, #tpu.memory_space<vmem>>) attributes {dimension_semantics = [#tpu.dimension_semantics<parallel>], iteration_bounds = array<i64: 1>, scalar_prefetch = 0 : i64, scratch_operands = 0 : i64, tpu.core_type = #tpu.core_type<tc>, window_params = [{transform_indices = @transform_0, window_bounds = array<i64: 8, 16>}, {pipeline_mode = #tpu.pipeline_mode<synchronous>, transform_indices = @transform_1, window_bounds = array<i64: 16, 128>}, {pipeline_mode = #tpu.pipeline_mode<synchronous>, transform_indices = @transform_2, window_bounds = array<i64: 128, 128>}, {pipeline_mode = #tpu.pipeline_mode<synchronous>, transform_indices = @transform_3, window_bounds = array<i64: 128, 128>}, {pipeline_mode = #tpu.pipeline_mode<synchronous>, transform_indices = @transform_4, window_bounds = array<i64: 4, 128>}, {transform_indices = @transform_5, window_bounds = array<i64: 8, 128>}]} {
    %c0 = arith.constant 0 : index
    %c0_0 = arith.constant 0 : index
    %0 = vector.load %arg1[%c0, %c0_0] : memref<8x16xf32, #tpu.memory_space<vmem>>, vector<8x16xf32>
    %c0_1 = arith.constant 0 : index
    %c0_2 = arith.constant 0 : index
    %1 = vector.load %arg2[%c0_1, %c0_2] : memref<16x128xf32, #tpu.memory_space<vmem>>, vector<16x128xf32>
    %cst = arith.constant dense<0.000000e+00> : vector<8x128xf32>
    %2 = tpu.matmul %0, %1, %cst {dimension_numbers = #tpu.dot_dimension_numbers<[1], [0], [0], [1], [0, 0, 1, 1], [], []>} : vector<8x16xf32>, vector<16x128xf32>, vector<8x128xf32> -> vector<8x128xf32>
    %c0_3 = arith.constant 0 : index
    %c0_4 = arith.constant 0 : index
    %3 = vector.load %arg5[%c0_3, %c0_4] : memref<4x128xf32, #tpu.memory_space<vmem>>, vector<1x128xf32>
    %4 = vector.broadcast %3 : vector<1x128xf32> to vector<8x128xf32>
    %5 = arith.addf %2, %4 : vector<8x128xf32>
    %c0_5 = arith.constant 0 : index
    %c0_6 = arith.constant 0 : index
    %6 = vector.load %arg3[%c0_5, %c0_6] : memref<128x128xf32, #tpu.memory_space<vmem>>, vector<128x128xf32>
    %cst_7 = arith.constant dense<0.000000e+00> : vector<8x128xf32>
    %7 = tpu.matmul %5, %6, %cst_7 {dimension_numbers = #tpu.dot_dimension_numbers<[1], [0], [0], [1], [0, 0, 1, 1], [], []>} : vector<8x128xf32>, vector<128x128xf32>, vector<8x128xf32> -> vector<8x128xf32>
    %c1 = arith.constant 1 : index
    %c0_8 = arith.constant 0 : index
    %8 = vector.load %arg5[%c1, %c0_8] : memref<4x128xf32, #tpu.memory_space<vmem>>, vector<1x128xf32>
    %9 = vector.broadcast %8 : vector<1x128xf32> to vector<8x128xf32>
    %10 = arith.addf %7, %9 : vector<8x128xf32>
    %cst_9 = arith.constant 0.000000e+00 : f32
    %11 = vector.broadcast %cst_9 : f32 to vector<8x128xf32>
    %12 = arith.maximumf %10, %11 : vector<8x128xf32>
    %c0_10 = arith.constant 0 : index
    %c0_11 = arith.constant 0 : index
    %13 = vector.load %arg4[%c0_10, %c0_11] : memref<128x128xf32, #tpu.memory_space<vmem>>, vector<128x128xf32>
    %cst_12 = arith.constant dense<0.000000e+00> : vector<8x128xf32>
    %14 = tpu.matmul %12, %13, %cst_12 {dimension_numbers = #tpu.dot_dimension_numbers<[1], [0], [0], [1], [0, 0, 1, 1], [], []>} : vector<8x128xf32>, vector<128x128xf32>, vector<8x128xf32> -> vector<8x128xf32>
    %c2 = arith.constant 2 : index
    %c0_13 = arith.constant 0 : index
    %15 = vector.load %arg5[%c2, %c0_13] : memref<4x128xf32, #tpu.memory_space<vmem>>, vector<1x128xf32>
    %16 = vector.broadcast %15 : vector<1x128xf32> to vector<8x128xf32>
    %17 = arith.addf %14, %16 : vector<8x128xf32>
    %c0_14 = arith.constant 0 : index
    %c0_15 = arith.constant 0 : index
    %18 = vector.load %arg6[%c0_14, %c0_15] : memref<8x128xf32, #tpu.memory_space<vmem>>, vector<8x128xf32>
    tpu.vector_store %arg6[%c0_14, %c0_15], %17 {strides = array<i32>} : memref<8x128xf32, #tpu.memory_space<vmem>>, vector<8x128xf32>,
    return
  }
  func.func @transform_0(%arg0: i32) -> (i32, i32) {
    %c0_i32 = arith.constant 0 : i32
    %c0_i32_0 = arith.constant 0 : i32
    return %arg0, %c0_i32 : i32, i32
  }
  func.func @transform_1(%arg0: i32) -> (i32, i32) {
    %c0_i32 = arith.constant 0 : i32
    %c0_i32_0 = arith.constant 0 : i32
    %c0_i32_1 = arith.constant 0 : i32
    return %c0_i32, %c0_i32_0 : i32, i32
  }
  func.func @transform_2(%arg0: i32) -> (i32, i32) {
    %c0_i32 = arith.constant 0 : i32
    %c0_i32_0 = arith.constant 0 : i32
    %c0_i32_1 = arith.constant 0 : i32
    return %c0_i32, %c0_i32_0 : i32, i32
  }
  func.func @transform_3(%arg0: i32) -> (i32, i32) {
    %c0_i32 = arith.constant 0 : i32
    %c0_i32_0 = arith.constant 0 : i32
    %c0_i32_1 = arith.constant 0 : i32
    return %c0_i32, %c0_i32_0 : i32, i32
  }
  func.func @transform_4(%arg0: i32) -> (i32, i32) {
    %c0_i32 = arith.constant 0 : i32
    %c0_i32_0 = arith.constant 0 : i32
    %c0_i32_1 = arith.constant 0 : i32
    return %c0_i32, %c0_i32_0 : i32, i32
  }
  func.func @transform_5(%arg0: i32) -> (i32, i32) {
    %c0_i32 = arith.constant 0 : i32
    %c0_i32_0 = arith.constant 0 : i32
    return %arg0, %c0_i32 : i32, i32
  }
}

</mosaic_0001>

<bundles_post_ra>
// kernel: tpu_custom_call.1
= control target key start
LH: loop header
LB: loop body
LE: loop exit
PB: predicated region body
PF: predicated region fallthrough
CT: control target
= control target key end

     0   :  { %10 = vsyncpa [#allocation3], 0  ;;  %s792_s0 = inlined_call_operand.hbm [shape: f32[8,16], index: 0, kind: input, shape index: {}]   ;;  %s793_s1 = inlined_call_operand.hbm [shape: f32[16,128], index: 1, kind: input, shape index: {}]   ;;  %s794_s2 = inlined_call_operand.hbm [shape: f32[128,128], index: 2, kind: input, shape index: {}]   ;;  %s795_s3 = inlined_call_operand.hbm [shape: f32[128,128], index: 3, kind: input, shape index: {}]   ;;  %s796_s4 = inlined_call_operand.vmem [shape: f32[4,128], index: 4, kind: input, shape index: {}]   ;;  %s797_s5 = inlined_call_operand.hbm [shape: f32[8,128], index: 5, kind: output, shape index: {}]  }
   0x1   :  { %11 = vsyncpa [#allocation6], 0 }
   0x2   :  { %12 = vsyncpa [#allocation9], 0 }
   0x3   :  { %13 = vsyncpa [#allocation4], 0  ;;  %s654_s18 = smov [#allocation5]   ;;  %s536_s22 = scalar_lea.hbm %s793_s1, 256 }
   0x4   :  { %s29_s19 = sshll.u32 %s654_s18, 4  ;;  %p537_p0 = scmp.ne.s32.totalorder %s793_s1, %s536_s22  ;;  %s30_s19 = int_to_ptr.vmem [resolvable:$true] %s29_s19 }
   0x5   :  { %p540_p1 = scmp.lt.u32.totalorder %s536_s22, %s793_s1 }
   0x7   :  { %p542_p2 = pnand %p540_p1, %p537_p0 }
   0x9   :  { %545 = shalt.err (!%p542_p2)
}
   0xa   :  { %s546_s27 = scalar_lea.vmem %s30_s19, 256  ;;  %p551_p4 = scmp.lt.s32.totalorder %s30_s19, %s30_s19 }
   0xb   :  { %p547_p3 = scmp.ne.s32.totalorder %s30_s19, %s546_s27  ;;  %p552_p5 = scmp.lt.s32.totalorder %s546_s27, %s546_s27 }
   0xd   :  { %p553_p6 = por %p552_p5, %p551_p4 }
   0xf   :  { %p554_p7 = pnand %p553_p6, %p547_p3 }
  0x11   :  { %557 = shalt.err (!%p554_p7)
}
  0x12   :  { %s655_s28 = smov 128   ;;  %s656_s29 = smov 8  }
  0x13   :  { %35 = dma.hbm_to_vmem [thread:$0]  %s793_s1, 256, %s30_s19, [#allocation6], %s655_s28, %s655_s28, %s656_s29  }
  0x14   :  { %s657_s7 = smov [#allocation2]   ;;  %s658_s9 = smov [#allocation7]  }
  0x15   :  { %s20_s8 = sshll.u32 %s657_s7, 4  ;;  %s41_s10 = sshll.u32 %s658_s9, 4  ;;  %s21_s8 = int_to_ptr.vmem [resolvable:$true] %s20_s8  ;;  %s42_s10 = int_to_ptr.vmem [resolvable:$true] %s41_s10 }
  0x16   :  { %s558_s13 = scalar_lea.hbm %s792_s0, 128 }
  0x17   :  { %p559_p8 = scmp.ne.s32.totalorder %s792_s0, %s558_s13  ;;  %p562_p9 = scmp.lt.u32.totalorder %s558_s13, %s792_s0 }
  0x19   :  { %p564_p10 = pnand %p562_p9, %p559_p8 }
  0x1b   :  { %567 = shalt.err (!%p564_p10)
}
  0x1c   :  { %s568_s1 = scalar_lea.vmem %s21_s8, 128  ;;  %p573_p12 = scmp.lt.s32.totalorder %s21_s8, %s21_s8 }
  0x1d   :  { %p569_p11 = scmp.ne.s32.totalorder %s21_s8, %s568_s1  ;;  %p574_p13 = scmp.lt.s32.totalorder %s568_s1, %s568_s1 }
  0x1f   :  { %p575_p0 = por %p574_p13, %p573_p12 }
  0x21   :  { %p576_p1 = pnand %p575_p0, %p569_p11 }
  0x23   :  { %579 = shalt.err (!%p576_p1)
}
  0x24   :  { %23 = dma.hbm_to_vmem [thread:$0]  %s792_s0, 128, %s21_s8, [#allocation3]  }
  0x25   :  { %s580_s22 = scalar_lea.hbm %s794_s2, 2048 }
  0x26   :  { %p581_p2 = scmp.ne.s32.totalorder %s794_s2, %s580_s22  ;;  %p584_p3 = scmp.lt.u32.totalorder %s580_s22, %s794_s2 }
  0x28   :  { %p586_p4 = pnand %p584_p3, %p581_p2 }
  0x2a   :  { %589 = shalt.err (!%p586_p4)
}
  0x2b   :  { %s590_s27 = scalar_lea.vmem %s42_s10, 2048  ;;  %p595_p6 = scmp.lt.s32.totalorder %s42_s10, %s42_s10 }
  0x2c   :  { %p591_p5 = scmp.ne.s32.totalorder %s42_s10, %s590_s27  ;;  %p596_p7 = scmp.lt.s32.totalorder %s590_s27, %s590_s27 }
  0x2e   :  { %p597_p8 = por %p596_p7, %p595_p6 }
  0x30   :  { %p598_p9 = pnand %p597_p8, %p591_p5 }
  0x32   :  { %601 = shalt.err (!%p598_p9)
}
  0x33   :  { %47 = dma.hbm_to_vmem [thread:$0]  %s794_s2, 2048, %s42_s10, [#allocation6], %s655_s28, %s655_s28, %s656_s29  }
  0x34   :  { %s659_s6 = smov [#allocation8]   ;;  %s602_s11 = scalar_lea.hbm %s795_s3, 2048 }
  0x35   :  { %s53_s7 = sshll.u32 %s659_s6, 4  ;;  %p603_p10 = scmp.ne.s32.totalorder %s795_s3, %s602_s11  ;;  %s54_s7 = int_to_ptr.vmem [resolvable:$true] %s53_s7 }
  0x36   :  { %p606_p11 = scmp.lt.u32.totalorder %s602_s11, %s795_s3 }
  0x38   :  { %p608_p12 = pnand %p606_p11, %p603_p10 }
  0x3a   :  { %611 = shalt.err (!%p608_p12)
}
  0x3b   :  { %s612_s16 = scalar_lea.vmem %s54_s7, 2048  ;;  %p617_p0 = scmp.lt.s32.totalorder %s54_s7, %s54_s7 }
  0x3c   :  { %p613_p13 = scmp.ne.s32.totalorder %s54_s7, %s612_s16  ;;  %p618_p1 = scmp.lt.s32.totalorder %s612_s16, %s612_s16 }
  0x3e   :  { %p619_p2 = por %p618_p1, %p617_p0 }
  0x40   :  { %p620_p3 = pnand %p619_p2, %p613_p13 }
  0x42   :  { %623 = shalt.err (!%p620_p3)
}
  0x43   :  { %59 = dma.hbm_to_vmem [thread:$0]  %s795_s3, 2048, %s54_s7, [#allocation9], %s655_s28, %s655_s28, %s656_s29  }
  0x44   :  { %646 = dma.done.wait [#allocation3], 128  }
  0x45   :  { %647 = vsyncadd [#allocation3], 4294967168 }
  0x46   :  { %648 = dma.done.wait [#allocation6], 2304  }
  0x47   :  { %649 = vsyncadd [#allocation6], 4294964992 }
  0x48   :  { %650 = dma.done.wait [#allocation9], 2048  }
  0x49   :  { %651 = vsyncadd [#allocation9], 4294965248  ;;  %v660_v0 = vmov 0.0|0.0   ;;  %vm661_vm0 = vmmov 0   ;;  %v662_v1 = vmov 0.0   ;;  %v75_v2 = vld [vmem:[#allocation5] sm:$0xff] }
  0x4a   :  { %475 = vmatprep.subr.bf16.mxu0 %v660_v0  ;;  %402 = vmatprep.mubr.msk.f32.mxu0 %vm661_vm0, %v662_v1  ;;  %v76_v3 = vld [vmem:[#allocation5 + $0x8] sm:$0xff]  ;;  %v156_v5 = vld [vmem:[#allocation7] sm:$0xff]  ;;  %v157_v6 = vld [vmem:[#allocation7 + $0x8] sm:$0xff]  ;;  %vm82_vm1 = vcmask 130048   ;;  %s663_s19 = smov [#allocation10]  }
  0x4b   :  { %478 = vmatprep.subr.bf16.mxu1 %v660_v0  ;;  %437 = vmatprep.mubr.msk.f32.mxu1 %vm661_vm0, %v662_v1  ;;  %v476_v4 = vpack.c.bf16 %v76_v3, %v75_v2  ;;  %v158_v7 = vld [vmem:[#allocation7 + $0x10] sm:$0xff]  ;;  %v479_v8 = vpack.c.bf16 %v157_v6, %v156_v5  ;;  %v159_v9 = vld [vmem:[#allocation7 + $0x18] sm:$0xff]  ;;  %v74_v10 = vld [vmem:[#allocation2] sm:$0xff]  ;;  %s346_s20 = sshll.u32 %s663_s19, 4  ;;  %s347_s20 = int_to_ptr.vmem [resolvable:$true] %s346_s20 }
  0x4c   :  { %v482_v11 = vpack.c.bf16 %v159_v9, %v158_v7  ;;  %v160_v12 = vld [vmem:[#allocation7 + $0x20] sm:$0xff]  ;;  %v161_v13 = vld [vmem:[#allocation7 + $0x28] sm:$0xff]  ;;  %v162_v15 = vld [vmem:[#allocation7 + $0x30] sm:$0xff]  ;;  %s624_s21 = scalar_lea.vmem %s347_s20, 128  ;;  %p629_p5 = scmp.lt.s32.totalorder %s347_s20, %s347_s20 }
  0x4d   :  { %477 = vmatpush3.bf16.msra.mxu0 %v476_v4  ;;  %480 = vmatpush3.bf16.msra.mxu1 %v479_v8  ;;  %v485_v14 = vpack.c.bf16 %v161_v13, %v160_v12  ;;  %v163_v16 = vld [vmem:[#allocation7 + $0x38] sm:$0xff]  ;;  %v164_v18 = vld [vmem:[#allocation7 + $0x40] sm:$0xff]  ;;  %v165_v19 = vld [vmem:[#allocation7 + $0x48] sm:$0xff]  ;;  %p625_p4 = scmp.ne.s32.totalorder %s347_s20, %s624_s21  ;;  %p630_p6 = scmp.lt.s32.totalorder %s624_s21, %s624_s21 }
  0x4e   :  { %502 = vmatprep.subr.bf16.mxu0 %v660_v0  ;;  %481 = vmatprep.subr.bf16.mxu1 %v660_v0  ;;  %v488_v17 = vpack.c.bf16 %v163_v16, %v162_v15  ;;  %v491_v20 = vpack.c.bf16 %v165_v19, %v164_v18  ;;  %v166_v21 = vld [vmem:[#allocation7 + $0x50] sm:$0xff]  ;;  %v167_v22 = vld [vmem:[#allocation7 + $0x58] sm:$0xff]  ;;  %v168_v24 = vld [vmem:[#allocation7 + $0x60] sm:$0xff] }
  0x4f   :  { %v494_v23 = vpack.c.bf16 %v167_v22, %v166_v21  ;;  %v169_v25 = vld [vmem:[#allocation7 + $0x68] sm:$0xff]  ;;  %v170_v27 = vld [vmem:[#allocation7 + $0x70] sm:$0xff]  ;;  %v171_v28 = vld [vmem:[#allocation7 + $0x78] sm:$0xff]  ;;  %p631_p7 = por %p630_p6, %p629_p5 }
  0x50   :  { %403 = vmatmul.mubr.msk.f32.vlgmr.msra.gmra.mrb[0].mxu0 %vm82_vm1, %v74_v10  ;;  %v497_v26 = vpack.c.bf16 %v169_v25, %v168_v24  ;;  %v500_v29 = vpack.c.bf16 %v171_v28, %v170_v27  ;;  %v248_v30 = vld [vmem:[#allocation8] sm:$0xff]  ;;  %v249_v31 = vld [vmem:[#allocation8 + $0x8] sm:$0xff]  ;;  %v250_v32 = vld [vmem:[#allocation8 + $0x10] sm:$0xff] }
  0x51   :  { %472 = vmatprep.mubr.msk.f32.mxu0 %vm661_vm0, %v662_v1  ;;  %483 = vmatpush3.bf16.msra.mxu1 %v482_v11  ;;  %v503_v33 = vpack.c.bf16 %v249_v31, %v248_v30  ;;  %v251_v34 = vld [vmem:[#allocation8 + $0x18] sm:$0xff]  ;;  %v252_v36 = vld [vmem:[#allocation8 + $0x20] sm:$0xff]  ;;  %v253_v37 = vld [vmem:[#allocation8 + $0x28] sm:$0xff]  ;;  %p632_p8 = pnand %p631_p7, %p625_p4 }
  0x52   :  { %484 = vmatprep.subr.bf16.mxu1 %v660_v0  ;;  %v506_v35 = vpack.c.bf16 %v251_v34, %v250_v32  ;;  %v509_v38 = vpack.c.bf16 %v253_v37, %v252_v36  ;;  %v254_v39 = vld [vmem:[#allocation8 + $0x30] sm:$0xff]  ;;  %v255_v40 = vld [vmem:[#allocation8 + $0x38] sm:$0xff]  ;;  %v256_v42 = vld [vmem:[#allocation8 + $0x40] sm:$0xff] }
  0x53   :  { %504 = vmatpush3.bf16.msra.mxu0 %v503_v33  ;;  %v512_v41 = vpack.c.bf16 %v255_v40, %v254_v39  ;;  %v257_v43 = vld [vmem:[#allocation8 + $0x48] sm:$0xff]  ;;  %v258_v45 = vld [vmem:[#allocation8 + $0x50] sm:$0xff]  ;;  %v259_v46 = vld [vmem:[#allocation8 + $0x58] sm:$0xff] }
  0x54   :  { %505 = vmatprep.subr.bf16.mxu0 %v660_v0  ;;  %v515_v44 = vpack.c.bf16 %v257_v43, %v256_v42  ;;  %v518_v47 = vpack.c.bf16 %v259_v46, %v258_v45  ;;  %v260_v48 = vld [vmem:[#allocation8 + $0x60] sm:$0xff]  ;;  %v261_v49 = vld [vmem:[#allocation8 + $0x68] sm:$0xff]  ;;  %v262_v55 = vld [vmem:[#allocation8 + $0x70] sm:$0xff] }
  0x55   :  { %486 = vmatpush3.bf16.msra.mxu1 %v485_v14  ;;  %v521_v50 = vpack.c.bf16 %v261_v49, %v260_v48  ;;  %v357_v51 = vld [vmem:[%s796_s4] ss:$0 sm:$0xff]  ;;  %v263_v56 = vld [vmem:[#allocation8 + $0x78] sm:$0xff]  ;;  %v359_v58 = vld [vmem:[%s796_s4 + $0x1] ss:$0 sm:$0xff] }
  0x56   :  { %487 = vmatprep.subr.bf16.mxu1 %v660_v0  ;;  %v524_v57 = vpack.c.bf16 %v263_v56, %v262_v55  ;;  %v360_v63 = vld [vmem:[%s796_s4 + $0x2] ss:$0 sm:$0xff] }
  0x57   :  { %507 = vmatpush3.bf16.msra.mxu0 %v506_v35 }
  0x58   :  { %508 = vmatprep.subr.bf16.mxu0 %v660_v0 }
  0x59   :  { %489 = vmatpush3.bf16.msra.mxu1 %v488_v17 }
  0x5a   :  { %490 = vmatprep.subr.bf16.mxu1 %v660_v0 }
  0x5b   :  { %510 = vmatpush3.bf16.msra.mxu0 %v509_v38 }
  0x5c   :  { %511 = vmatprep.subr.bf16.mxu0 %v660_v0 }
  0x5d   :  { %492 = vmatpush3.bf16.msra.mxu1 %v491_v20 }
  0x5e   :  { %493 = vmatprep.subr.bf16.mxu1 %v660_v0 }
  0x5f   :  { %513 = vmatpush3.bf16.msra.mxu0 %v512_v41 }
  0x60   :  { %514 = vmatprep.subr.bf16.mxu0 %v660_v0 }
  0x61   :  { %495 = vmatpush3.bf16.msra.mxu1 %v494_v23 }
  0x62   :  { %496 = vmatprep.subr.bf16.mxu1 %v660_v0 }
  0x63   :  { %516 = vmatpush3.bf16.msra.mxu0 %v515_v44 }
  0x64   :  { %517 = vmatprep.subr.bf16.mxu0 %v660_v0 }
  0x65   :  { %498 = vmatpush3.bf16.msra.mxu1 %v497_v26 }
  0x66   :  { %499 = vmatprep.subr.bf16.mxu1 %v660_v0 }
  0x67   :  { %519 = vmatpush3.bf16.msra.mxu0 %v518_v47 }
  0x68   :  { %520 = vmatprep.subr.bf16.mxu0 %v660_v0 }
  0x69   :  { %501 = vmatpush3.bf16.msra.mxu1 %v500_v29 }
  0x6b   :  { %522 = vmatpush3.bf16.msra.mxu0 %v521_v50 }
  0x6c   :  { %523 = vmatprep.subr.bf16.mxu0 %v660_v0 }
  0x6f   :  { %525 = vmatpush3.bf16.msra.mxu0 %v524_v57 }
 0x123   :  { %v152_v52 = vpop.f32.mrb[0].mxu0 }
 0x124   :  { %v153_v53 = vadd.f32 %v357_v51, %v152_v52  ;;  %v404_v54 = vpop.f32.mrb[1].mxu0 }
 0x126   :  { %438 = vmatmul.mubr.f32.vlgmr.msra.gmra.mrb[0].mxu1 %v153_v53 }
 0x1f9   :  { %v243_v59 = vpop.f32.mrb[0].mxu1 }
 0x1fa   :  { %v244_v60 = vadd.f32 %v359_v58, %v243_v59  ;;  %v439_v61 = vpop.f32.mrb[1].mxu1 }
 0x1fc   :  { %v247_v62 = vmax.f32 %v244_v60, 0.0 }
 0x1fe   :  { %473 = vmatmul.mubr.f32.vlgmr.msra.gmra.mrb[2].mxu0 %v247_v62 }
 0x2d1   :  { %v335_v0 = vpop.f32.mrb[2].mxu0 }
 0x2d2   :  { %v336_v1 = vadd.f32 %v360_v63, %v335_v0  ;;  %v474_v2 = vpop.f32.mrb[3].mxu0 }
 0x2d4   :  { %339 = vst [vmem:[#allocation10] sm:$0xff] %v336_v1 }
 0x2d5   :  { %635 = shalt.err (!%p632_p8)
}
 0x2d6   :  { %s636_s24 = scalar_lea.hbm %s797_s5, 128 }
 0x2d7   :  { %p637_p9 = scmp.ne.s32.totalorder %s797_s5, %s636_s24  ;;  %p640_p10 = scmp.lt.u32.totalorder %s636_s24, %s797_s5 }
 0x2d9   :  { %p642_p11 = pnand %p640_p10, %p637_p9 }
 0x2db   :  { %645 = shalt.err (!%p642_p11)
}
 0x2dc   :  { %349 = dma.vmem_to_hbm [thread:$0]  %s347_s20, 128, %s797_s5, [#allocation4]  }
 0x2dd   :  { %652 = dma.done.wait [#allocation4], 128  }
 0x2de   :  { %653 = vsyncadd [#allocation4], 4294967168 }
 0x2df   :  { %353 = vsyncpa [#allocation3], 1 }
 0x2e0   :  { %354 = vsyncpa [#allocation6], 1 }
 0x2e1   :  { %355 = vsyncpa [#allocation9], 1 }
 0x2e2   :  { %356 = vsyncpa [#allocation4], 1 }

</bundles_post_ra>
